<compile_context>
chip_gen: v6e
topology: v6e:2x2x1
jax: 0.10.0
libtpu: 0.0.40
codegen_flags: <defaults>
</compile_context>

<pallas_src>
import jax
import jax.numpy as jnp
from jax import lax
from jax.experimental import pallas as pl
from jax.experimental.pallas import tpu as pltpu


# ----------------------------------------------------------------------------
# Pallas kernel
# ----------------------------------------------------------------------------
def _downsample_kernel(x_ref, w_ref, o_ref):
    """One row-strip of the 2x2/stride-2 conv as two MXU matmuls.

    x_ref: (th, 2, OW, 2*C)  packed input view; axis 1 = ky, last axis = (kx, ci)
    w_ref: (2, 2*C, Cout)    weight; axis 0 = ky, middle axis = (kx, ci)
    o_ref: (th, OW, Cout)
    """
    th, ow, cout = o_ref.shape
    k = x_ref.shape[-1]                      # 2*C
    # ky = 0 / ky = 1 rows of the strip.  The (th, OW) -> th*OW flatten is a
    # lane/sublane-aligned, layout-preserving reshape done entirely in VMEM.
    x_top = x_ref[:, 0, :, :].reshape(th * ow, k)
    x_bot = x_ref[:, 1, :, :].reshape(th * ow, k)
    acc = jnp.dot(x_top, w_ref[0], preferred_element_type=jnp.float32)
    acc = acc + jnp.dot(x_bot, w_ref[1], preferred_element_type=jnp.float32)
    o_ref[...] = acc.reshape(th, ow, cout).astype(o_ref.dtype)


# ----------------------------------------------------------------------------
# Wrapper (PyTorch-compatible NCHW / OIHW interface)
# ----------------------------------------------------------------------------
def downsample(x, w, *, compute_dtype=None, vmem_budget_bytes=8 << 20):
    """Downsample.forward: Conv2d(C, 2C, kernel_size=2, stride=2, bias=False).

    x: (B, C, H, W) NCHW.   w: (2C, C, 2, 2) PyTorch OIHW.
    Returns (B, 2C, H//2, W//2) NCHW with dtype of x.
    """
    B, C, H, W = x.shape
    Cout, Cin, KH, KW = w.shape
    assert Cin == C and KH == 2 and KW == 2 and Cout == 2 * C
    assert H % 2 == 0 and W % 2 == 0
    OH, OW = H // 2, W // 2
    assert OW % 8 == 0, "W//2 must be a multiple of 8 (sublane alignment)"

    # NCHW -> NHWC (single XLA relayout), then a *free* row-major view reshape
    # that performs the space-to-depth: last axis packs (kx, ci).
    xh = jnp.transpose(x, (0, 2, 3, 1))                       # (B, H, W, C)
    xr = xh.reshape(B * OH, 2, OW, 2 * C)                     # free view

    # weight (Cout, Cin, ky, kx) -> (ky, kx*Cin, Cout); tiny, done once.
    wr = jnp.transpose(w, (2, 3, 1, 0)).reshape(2, 2 * C, Cout)

    if compute_dtype is not None:
        xr = xr.astype(compute_dtype)
        wr = wr.astype(compute_dtype)

    # Row-strip tile: as many output rows per grid step as the VMEM budget
    # allows (input + output, double-buffered), but keep >= 2 grid steps when
    # possible so a v7x chip's two TensorCores both get work.
    rows = B * OH
    itemsize = jnp.dtype(xr.dtype).itemsize
    row_bytes = 2 * (2 * OW * 2 * C + OW * Cout) * itemsize
    th = max(1, min(rows, vmem_budget_bytes // max(row_bytes, 1),
                    max(1, rows // 2)))
    while rows % th:
        th -= 1

    out_flat = pl.pallas_call(
        _downsample_kernel,
        out_shape=jax.ShapeDtypeStruct((rows, OW, Cout), x.dtype),
        grid_spec=pl.GridSpec(
            grid=(rows // th,),
            in_specs=[
                pl.BlockSpec((th, 2, OW, 2 * C), lambda i: (i, 0, 0, 0)),
                pl.BlockSpec((2, 2 * C, Cout), lambda i: (0, 0, 0)),
            ],
            out_specs=pl.BlockSpec((th, OW, Cout), lambda i: (i, 0, 0)),
        ),
        compiler_params=pltpu.CompilerParams(
            dimension_semantics=("parallel",),
        ),
    )(xr, wr)

    out_nhwc = out_flat.reshape(B, OH, OW, Cout)              # free view
    return jnp.transpose(out_nhwc, (0, 3, 1, 2))              # NHWC -> NCHW


# ----------------------------------------------------------------------------
# Pure-JAX reference (what XLA would run for the PyTorch module)
# ----------------------------------------------------------------------------
def downsample_ref(x, w):
    return lax.conv_general_dilated(
        x, w, window_strides=(2, 2), padding="VALID",
        dimension_numbers=("NCHW", "OIHW", "NCHW"))


# ----------------------------------------------------------------------------
if __name__ == "__main__":
    B, C, H, W = 2, 64, 16, 16          # channel=64 -> 2*C = 128 (lane-dense)
    key = jax.random.PRNGKey(0)
    kx, kw = jax.random.split(key)
    x = jax.random.normal(kx, (B, C, H, W), jnp.float32)
    w = jax.random.normal(kw, (2 * C, C, 2, 2), jnp.float32) * (4.0 * C) ** -0.5

    fwd = jax.jit(downsample)
    out = fwd(x, w)
    jax.block_until_ready(out)

    assert out.shape == (B, 2 * C, H // 2, W // 2)
    assert bool(jnp.all(jnp.isfinite(out)))

    ref = downsample_ref(x, w)
    max_err = float(jnp.max(jnp.abs(out - ref)))
    assert jnp.allclose(out, ref, rtol=2e-2, atol=2e-2), f"max abs err {max_err}"

    print("KERNEL_OK")
</pallas_src>

<mosaic_0001>
module attributes {stable_mosaic.version = 11 : i64} {
  func.func @_downsample_kernel(%arg0: i32, %arg1: memref<8x2x8x128xf32, #tpu.memory_space<vmem>>, %arg2: memref<2x128x128xf32, #tpu.memory_space<vmem>>, %arg3: memref<8x8x128xf32, #tpu.memory_space<vmem>>) attributes {dimension_semantics = [#tpu.dimension_semantics<parallel>], iteration_bounds = array<i64: 2>, scalar_prefetch = 0 : i64, scratch_operands = 0 : i64, tpu.core_type = #tpu.core_type<tc>, window_params = [{transform_indices = @transform_0, window_bounds = array<i64: 8, 2, 8, 128>}, {pipeline_mode = #tpu.pipeline_mode<synchronous>, transform_indices = @transform_1, window_bounds = array<i64: 2, 128, 128>}, {transform_indices = @transform_2, window_bounds = array<i64: 8, 8, 128>}]} {
    %c0 = arith.constant 0 : index
    %c0_0 = arith.constant 0 : index
    %c0_1 = arith.constant 0 : index
    %c0_2 = arith.constant 0 : index
    %0 = vector.load %arg1[%c0, %c0_0, %c0_1, %c0_2] : memref<8x2x8x128xf32, #tpu.memory_space<vmem>>, vector<8x1x8x128xf32>
    %1 = vector.shape_cast %0 : vector<8x1x8x128xf32> to vector<8x8x128xf32>
    %2 = vector.shape_cast %1 : vector<8x8x128xf32> to vector<64x128xf32>
    %c0_3 = arith.constant 0 : index
    %c1 = arith.constant 1 : index
    %c0_4 = arith.constant 0 : index
    %c0_5 = arith.constant 0 : index
    %3 = vector.load %arg1[%c0_3, %c1, %c0_4, %c0_5] : memref<8x2x8x128xf32, #tpu.memory_space<vmem>>, vector<8x1x8x128xf32>
    %4 = vector.shape_cast %3 : vector<8x1x8x128xf32> to vector<8x8x128xf32>
    %5 = vector.shape_cast %4 : vector<8x8x128xf32> to vector<64x128xf32>
    %c0_6 = arith.constant 0 : index
    %c0_7 = arith.constant 0 : index
    %c0_8 = arith.constant 0 : index
    %6 = vector.load %arg2[%c0_6, %c0_7, %c0_8] : memref<2x128x128xf32, #tpu.memory_space<vmem>>, vector<1x128x128xf32>
    %7 = vector.shape_cast %6 : vector<1x128x128xf32> to vector<128x128xf32>
    %cst = arith.constant dense<0.000000e+00> : vector<64x128xf32>
    %8 = tpu.matmul %2, %7, %cst {dimension_numbers = #tpu.dot_dimension_numbers<[1], [0], [0], [1], [0, 0, 1, 1], [], []>} : vector<64x128xf32>, vector<128x128xf32>, vector<64x128xf32> -> vector<64x128xf32>
    %c1_9 = arith.constant 1 : index
    %c0_10 = arith.constant 0 : index
    %c0_11 = arith.constant 0 : index
    %9 = vector.load %arg2[%c1_9, %c0_10, %c0_11] : memref<2x128x128xf32, #tpu.memory_space<vmem>>, vector<1x128x128xf32>
    %10 = vector.shape_cast %9 : vector<1x128x128xf32> to vector<128x128xf32>
    %cst_12 = arith.constant dense<0.000000e+00> : vector<64x128xf32>
    %11 = tpu.matmul %5, %10, %cst_12 {dimension_numbers = #tpu.dot_dimension_numbers<[1], [0], [0], [1], [0, 0, 1, 1], [], []>} : vector<64x128xf32>, vector<128x128xf32>, vector<64x128xf32> -> vector<64x128xf32>
    %12 = arith.addf %8, %11 : vector<64x128xf32>
    %13 = vector.shape_cast %12 : vector<64x128xf32> to vector<8x8x128xf32>
    %c0_13 = arith.constant 0 : index
    %c0_14 = arith.constant 0 : index
    %c0_15 = arith.constant 0 : index
    %14 = vector.load %arg3[%c0_13, %c0_14, %c0_15] : memref<8x8x128xf32, #tpu.memory_space<vmem>>, vector<8x8x128xf32>
    tpu.vector_store %arg3[%c0_13, %c0_14, %c0_15], %13 {strides = array<i32>} : memref<8x8x128xf32, #tpu.memory_space<vmem>>, vector<8x8x128xf32>,
    return
  }
  func.func @transform_0(%arg0: i32) -> (i32, i32, i32, i32) {
    %c0_i32 = arith.constant 0 : i32
    %c0_i32_0 = arith.constant 0 : i32
    %c0_i32_1 = arith.constant 0 : i32
    %c0_i32_2 = arith.constant 0 : i32
    return %arg0, %c0_i32, %c0_i32_0, %c0_i32_1 : i32, i32, i32, i32
  }
  func.func @transform_1(%arg0: i32) -> (i32, i32, i32) {
    %c0_i32 = arith.constant 0 : i32
    %c0_i32_0 = arith.constant 0 : i32
    %c0_i32_1 = arith.constant 0 : i32
    %c0_i32_2 = arith.constant 0 : i32
    return %c0_i32, %c0_i32_0, %c0_i32_1 : i32, i32, i32
  }
  func.func @transform_2(%arg0: i32) -> (i32, i32, i32) {
    %c0_i32 = arith.constant 0 : i32
    %c0_i32_0 = arith.constant 0 : i32
    %c0_i32_1 = arith.constant 0 : i32
    return %arg0, %c0_i32, %c0_i32_0 : i32, i32, i32
  }
}

</mosaic_0001>

<bundles_post_ra>
// kernel: downsample.1
= control target key start
LH: loop header
LB: loop body
LE: loop exit
PB: predicated region body
PF: predicated region fallthrough
CT: control target
= control target key end

     0   :  { %7 = vsyncpa [#allocation3], 0  ;;  %s1018_s0 = inlined_call_operand.vmem [shape: f32[16,2,8,128], index: 0, kind: input, shape index: {}]   ;;  %s1019_s1 = inlined_call_operand.vmem [shape: f32[2,128,128], index: 1, kind: input, shape index: {}]   ;;  %s1020_s2 = inlined_call_operand.hbm [shape: f32[16,8,128], index: 2, kind: output, shape index: {}]  }
   0x1   :  { %9 = vsyncpa [#allocation3 + $0x1], 0  ;;  %s788_s9 = smov 0   ;;  %s790_s10 = smov 0  }
   0x2   :  { %s792_s11 = smov 0   ;;  %s794_s12 = smov 0  }
   0x3 LB: > { %s809_s13 = sadd.s32 4294967295, %s768_s12   ;;  %s492_s14 = sadd.s32 4294967294, %s768_s12   ;;  %s768_s12 = sphi %s794_s12, %s1026_s12   ;;  %s764_s11 = sphi %s792_s11, %s1025_s11   ;;  %s760_s10 = sphi %s790_s10, %s1024_s10   ;;  %s756_s9 = sphi %s788_s9, %s1023_s9  }
   0x4   : > { %s813_s15 = sadd.s32 1, %s768_s12   ;;  %s69_s16 = sadd.s32 1, %s764_s11 }
   0x5   : > { %s66_s17 = ssub.s32 %s768_s12, %s813_s15  ;;  %p79_p0 = scmp.ne.s32.totalorder %s764_s11, %s760_s10 }
   0x6   : > { %p67_p1 = scmp.eq.s32.totalorder %s66_s17, 0  ;;  %p80_p2 = scmp.eq.s32.totalorder %s809_s13, 1 }
   0x7   : > { %p85_p3 = scmp.ne.s32.totalorder %s760_s10, %s756_s9  ;;  %p86_p4 = scmp.eq.s32.totalorder %s492_s14, 1 }
   0x8   : > { %s824_s18 = scalar_select %p67_p1, %s764_s11, %s69_s16  }
   0x9   : > { %p826_p5 = por %p80_p2, %p79_p0  ;;  %p830_p6 = por %p86_p4, %p85_p3 }
   0xa   : > { %p495_p7 = scmp.ge.s32.totalorder %s768_s12, 1  ;;  %p117_p8 = scmp.lt.s32.totalorder %s768_s12, 3 }
   0xc   : > { %p118_p9 = pnand %p495_p7, %p117_p8 }
   0xd   : > { %s497_s6 = sshll.u32 (!%p118_p9), %s809_s13, 3  ;;  %s137_s5 = sand.u32 (!%p118_p9), 1, %s760_s10  }
   0xe   : > { %121 = sbr.rel (%p118_p9) target bundleno = 277 (0x115), region = 28  ;;  %p141_p10 = scmp.lt.s32.totalorder (!%p118_p9), %s497_s6, 15 }
   0xf   : > { %s496_s7 = sshll.u32 (!%p118_p9), %s137_s5, 6  ;;  %s770_s24 = smov (!%p118_p9), [#allocation2]  }
  0x10   : > { %s957_s8 = scalar_lea.vmem (!%p118_p9), [#allocation2], %s496_s7  ;;  %s712_s25 = sshll.u32 (!%p118_p9), %s770_s24, 4  ;;  %s713_s25 = int_to_ptr.vmem [resolvable:$false] %s712_s25 }
  0x11   : > { %s430_s16 = sshll.u32 (!%p118_p9), %s957_s8, 4  ;;  %s972_s16 = int_to_ptr.vmem [resolvable:$true] %s430_s16 }
  0x12   : > { %s708_s23 = scalar_lea.vmem (!%p118_p9), %s972_s16, 1024  ;;  %p715_p0 = scmp.lt.s32.totalorder (!%p118_p9), %s972_s16, %s713_s25 }
  0x13   : > { %v523_v0 = vld [vmem:[%s1019_s1 + $0xf8] sm:$0xff]  ;;  %v522_v2 = vld [vmem:[%s1019_s1 + $0xf0] sm:$0xff]  ;;  %v521_v4 = vld [vmem:[%s1019_s1 + $0xe8] sm:$0xff]  ;;  %s1028_s6 = smov (!%p141_p10, %s497_s6), 15  ;;  %p709_p11 = scmp.ne.s32.totalorder %s972_s16, %s708_s23 }
  0x14   : > { %v180_v1 = vld [vmem:[%s1019_s1 + $0x78] sm:$0xff]  ;;  %579 = vmatprep.subr.mxu0 %v523_v0  ;;  %v179_v3 = vld [vmem:[%s1019_s1 + $0x70] sm:$0xff]  ;;  %v178_v5 = vld [vmem:[%s1019_s1 + $0x68] sm:$0xff]  ;;  %s529_s14 = sshll.u32 %s1028_s6, 4  ;;  %s714_s6 = scalar_lea.vmem %s713_s25, 2048 }
  0x15   : > { %623 = vmatprep.subr.mxu1 %v180_v1  ;;  %580 = vmatpush3.msra.mxu0 %v523_v0  ;;  %v520_v6 = vld [vmem:[%s1019_s1 + $0xe0] sm:$0xff]  ;;  %v519_v8 = vld [vmem:[%s1019_s1 + $0xd8] sm:$0xff]  ;;  %v518_v10 = vld [vmem:[%s1019_s1 + $0xd0] sm:$0xff]  ;;  %s930_s28 = scalar_lea.vmem %s1018_s0, %s529_s14  ;;  %s530_s14 = sshll.u32 %s809_s13, 10 }
  0x16   : > { %624 = vmatpush3.msra.mxu1 %v180_v1  ;;  %581 = vmatprep.subr.mxu0 %v522_v2  ;;  %v177_v7 = vld [vmem:[%s1019_s1 + $0x60] sm:$0xff]  ;;  %v176_v9 = vld [vmem:[%s1019_s1 + $0x58] sm:$0xff]  ;;  %v175_v11 = vld [vmem:[%s1019_s1 + $0x50] sm:$0xff]  ;;  %s970_s22 = scalar_lea.hbm %s1020_s2, %s530_s14  ;;  %s978_s13 = scalar_lea.sflag [#allocation3], %s137_s5 }
  0x17   : > { %625 = vmatprep.subr.mxu1 %v179_v3  ;;  %582 = vmatpush3.msra.mxu0 %v522_v2  ;;  %v517_v12 = vld [vmem:[%s1019_s1 + $0xc8] sm:$0xff]  ;;  %v516_v14 = vld [vmem:[%s1019_s1 + $0xc0] sm:$0xff]  ;;  %v515_v16 = vld [vmem:[%s1019_s1 + $0xb8] sm:$0xff]  ;;  %p710_p12 = pnand %p709_p11, %p826_p5  ;;  %p716_p1 = scmp.lt.s32.totalorder %s714_s6, %s708_s23 }
  0x18   : > { %626 = vmatpush3.msra.mxu1 %v179_v3  ;;  %583 = vmatprep.subr.mxu0 %v521_v4  ;;  %v174_v13 = vld [vmem:[%s1019_s1 + $0x48] sm:$0xff]  ;;  %v173_v15 = vld [vmem:[%s1019_s1 + $0x40] sm:$0xff]  ;;  %v172_v17 = vld [vmem:[%s1019_s1 + $0x38] sm:$0xff] }
  0x19   : > { %627 = vmatprep.subr.mxu1 %v178_v5  ;;  %584 = vmatpush3.msra.mxu0 %v521_v4  ;;  %v514_v18 = vld [vmem:[%s1019_s1 + $0xb0] sm:$0xff]  ;;  %v513_v20 = vld [vmem:[%s1019_s1 + $0xa8] sm:$0xff]  ;;  %v512_v22 = vld [vmem:[%s1019_s1 + $0xa0] sm:$0xff]  ;;  %p711_p13 = pneg %p710_p12  ;;  %p717_p2 = por %p716_p1, %p715_p0 }
  0x1a   : > { %628 = vmatpush3.msra.mxu1 %v178_v5  ;;  %585 = vmatprep.subr.mxu0 %v520_v6  ;;  %v171_v19 = vld [vmem:[%s1019_s1 + $0x30] sm:$0xff]  ;;  %v170_v21 = vld [vmem:[%s1019_s1 + $0x28] sm:$0xff]  ;;  %v169_v23 = vld [vmem:[%s1019_s1 + $0x20] sm:$0xff] }
  0x1b   : > { %629 = vmatprep.subr.mxu1 %v177_v7  ;;  %586 = vmatpush3.msra.mxu0 %v520_v6  ;;  %v511_v24 = vld [vmem:[%s1019_s1 + $0x98] sm:$0xff]  ;;  %v510_v26 = vld [vmem:[%s1019_s1 + $0x90] sm:$0xff]  ;;  %v509_v28 = vld [vmem:[%s1019_s1 + $0x88] sm:$0xff]  ;;  %p718_p3 = pnand %p717_p2, %p711_p13 }
  0x1c   : > { %630 = vmatpush3.msra.mxu1 %v177_v7  ;;  %587 = vmatprep.subr.mxu0 %v519_v8  ;;  %v168_v25 = vld [vmem:[%s1019_s1 + $0x18] sm:$0xff]  ;;  %v167_v27 = vld [vmem:[%s1019_s1 + $0x10] sm:$0xff]  ;;  %v166_v29 = vld [vmem:[%s1019_s1 + $0x8] sm:$0xff] }
  0x1d   : > { %631 = vmatprep.subr.mxu1 %v176_v9  ;;  %588 = vmatpush3.msra.mxu0 %v519_v8  ;;  %v508_v30 = vld [vmem:[%s1019_s1 + $0x80] sm:$0xff]  ;;  %v500_v32 = vld [vmem:[%s930_s28 + $0x8] sm:$0xff]  ;;  %v501_v34 = vld [vmem:[%s930_s28 + $0x18] sm:$0xff] }
  0x1e   : > { %632 = vmatpush3.msra.mxu1 %v176_v9  ;;  %589 = vmatprep.subr.mxu0 %v518_v10  ;;  %v165_v31 = vld [vmem:[%s1019_s1] sm:$0xff]  ;;  %v149_v35 = vld [vmem:[%s930_s28 + $0x10] sm:$0xff]  ;;  %v502_v36 = vld [vmem:[%s930_s28 + $0x28] sm:$0xff] }
  0x1f   : > { %633 = vmatprep.subr.mxu1 %v175_v11  ;;  %590 = vmatpush3.msra.mxu0 %v518_v10  ;;  %v148_v33 = vld [vmem:[%s930_s28] sm:$0xff]  ;;  %v503_v38 = vld [vmem:[%s930_s28 + $0x38] sm:$0xff]  ;;  %v151_v39 = vld [vmem:[%s930_s28 + $0x30] sm:$0xff] }
  0x20   : > { %634 = vmatpush3.msra.mxu1 %v175_v11  ;;  %591 = vmatprep.subr.mxu0 %v517_v12  ;;  %v150_v37 = vld [vmem:[%s930_s28 + $0x20] sm:$0xff]  ;;  %v504_v40 = vld [vmem:[%s930_s28 + $0x48] sm:$0xff]  ;;  %v505_v42 = vld [vmem:[%s930_s28 + $0x58] sm:$0xff] }
  0x21   : > { %635 = vmatprep.subr.mxu1 %v174_v13  ;;  %592 = vmatpush3.msra.mxu0 %v517_v12  ;;  %v152_v41 = vld [vmem:[%s930_s28 + $0x40] sm:$0xff]  ;;  %v153_v43 = vld [vmem:[%s930_s28 + $0x50] sm:$0xff]  ;;  %v506_v44 = vld [vmem:[%s930_s28 + $0x68] sm:$0xff] }
  0x22   : > { %636 = vmatpush3.msra.mxu1 %v174_v13  ;;  %593 = vmatprep.subr.mxu0 %v516_v14  ;;  %v154_v45 = vld [vmem:[%s930_s28 + $0x60] sm:$0xff]  ;;  %v507_v46 = vld [vmem:[%s930_s28 + $0x78] sm:$0xff]  ;;  %v155_v47 = vld [vmem:[%s930_s28 + $0x70] sm:$0xff] }
  0x23   : > { %637 = vmatprep.subr.mxu1 %v173_v15  ;;  %594 = vmatpush3.msra.mxu0 %v516_v14 }
  0x24   : > { %638 = vmatpush3.msra.mxu1 %v173_v15  ;;  %595 = vmatprep.subr.mxu0 %v515_v16 }
  0x25   : > { %639 = vmatprep.subr.mxu1 %v172_v17  ;;  %596 = vmatpush3.msra.mxu0 %v515_v16 }
  0x26   : > { %640 = vmatpush3.msra.mxu1 %v172_v17  ;;  %597 = vmatprep.subr.mxu0 %v514_v18 }
  0x27   : > { %641 = vmatprep.subr.mxu1 %v171_v19  ;;  %598 = vmatpush3.msra.mxu0 %v514_v18 }
  0x28   : > { %642 = vmatpush3.msra.mxu1 %v171_v19  ;;  %599 = vmatprep.subr.mxu0 %v513_v20 }
  0x29   : > { %643 = vmatprep.subr.mxu1 %v170_v21  ;;  %600 = vmatpush3.msra.mxu0 %v513_v20 }
  0x2a   : > { %644 = vmatpush3.msra.mxu1 %v170_v21  ;;  %601 = vmatprep.subr.mxu0 %v512_v22 }
  0x2b   : > { %645 = vmatprep.subr.mxu1 %v169_v23  ;;  %602 = vmatpush3.msra.mxu0 %v512_v22 }
  0x2c   : > { %646 = vmatpush3.msra.mxu1 %v169_v23  ;;  %603 = vmatprep.subr.mxu0 %v511_v24 }
  0x2d   : > { %647 = vmatprep.subr.mxu1 %v168_v25  ;;  %604 = vmatpush3.msra.mxu0 %v511_v24 }
  0x2e   : > { %648 = vmatpush3.msra.mxu1 %v168_v25  ;;  %605 = vmatprep.subr.mxu0 %v510_v26 }
  0x2f   : > { %649 = vmatprep.subr.mxu1 %v167_v27  ;;  %606 = vmatpush3.msra.mxu0 %v510_v26 }
  0x30   : > { %650 = vmatpush3.msra.mxu1 %v167_v27  ;;  %607 = vmatprep.subr.mxu0 %v509_v28 }
  0x31   : > { %651 = vmatprep.subr.mxu1 %v166_v29  ;;  %608 = vmatpush3.msra.mxu0 %v509_v28 }
  0x32   : > { %652 = vmatpush3.msra.mxu1 %v166_v29  ;;  %609 = vmatprep.subr.mxu0 %v508_v30 }
  0x33   : > { %653 = vmatprep.subr.mxu1 %v165_v31  ;;  %610 = vmatpush3.msra.mxu0 %v508_v30 }
  0x34   : > { %611 = vmatprep.mubr.f32.mxu0 %v500_v32  ;;  %654 = vmatpush3.msra.mxu1 %v165_v31 }
  0x35   : > { %655 = vmatprep.mubr.f32.mxu1 %v148_v33  ;;  %612 = vmatmul.mubr.f32.vlgmr.msra.gmra.mxu0 %v501_v34 }
  0x36   : > { %656 = vmatmul.mubr.f32.vlgmr.msra.gmra.mxu1 %v149_v35  ;;  %614 = vmatprep.mubr.f32.mxu0 %v502_v36 }
  0x37   : > { %658 = vmatprep.mubr.f32.mxu1 %v150_v37 }
  0x39   : > { %615 = vmatmul.mubr.f32.gmra.mxu0 %v503_v38 }
  0x3a   : > { %659 = vmatmul.mubr.f32.gmra.mxu1 %v151_v39  ;;  %617 = vmatprep.mubr.f32.mxu0 %v504_v40 }
  0x3b   : > { %661 = vmatprep.mubr.f32.mxu1 %v152_v41 }
  0x3d   : > { %618 = vmatmul.mubr.f32.gmra.mxu0 %v505_v42 }
  0x3e   : > { %662 = vmatmul.mubr.f32.gmra.mxu1 %v153_v43  ;;  %620 = vmatprep.mubr.f32.mxu0 %v506_v44 }
  0x3f   : > { %664 = vmatprep.mubr.f32.mxu1 %v154_v45 }
  0x41   : > { %621 = vmatmul.mubr.f32.gmra.mxu0 %v507_v46 }
  0x42   : > { %665 = vmatmul.mubr.f32.gmra.mxu1 %v155_v47 }
  0xf5   : > { %v613_v48 = vpop.f32.mrf.mxu0 }
  0xf6   : > { %v657_v49 = vpop.f32.mrf.mxu1 }
  0xf7   : > { %v375_v50 = vadd.f32 %v657_v49, %v613_v48  ;;  %v264_v51 = vpop.f32.mrf.mxu0 }
  0xf8   : > { %v369_v52 = vpop.f32.mrf.mxu1 }
  0xf9   : > { %409 = vst [vmem:[%s957_s8 + $0x8] sm:$0xff] %v375_v50  ;;  %v370_v53 = vadd.f32 %v369_v52, %v264_v51  ;;  %v616_v54 = vpop.f32.mrf.mxu0 }
  0xfa   : > { %v660_v55 = vpop.f32.mrf.mxu1 }
  0xfb   : > { %408 = vst [vmem:[%s957_s8] sm:$0xff] %v370_v53  ;;  %v385_v56 = vadd.f32 %v660_v55, %v616_v54  ;;  %v274_v57 = vpop.f32.mrf.mxu0 }
  0xfc   : > { %v379_v58 = vpop.f32.mrf.mxu1 }
  0xfd   : > { %411 = vst [vmem:[%s957_s8 + $0x18] sm:$0xff] %v385_v56  ;;  %v380_v59 = vadd.f32 %v379_v58, %v274_v57  ;;  %v619_v60 = vpop.f32.mrf.mxu0 }
  0xfe   : > { %v663_v61 = vpop.f32.mrf.mxu1 }
  0xff   : > { %410 = vst [vmem:[%s957_s8 + $0x10] sm:$0xff] %v380_v59  ;;  %v395_v62 = vadd.f32 %v663_v61, %v619_v60  ;;  %v284_v63 = vpop.f32.mrf.mxu0 }
 0x100   : > { %v389_v0 = vpop.f32.mrf.mxu1 }
 0x101   : > { %413 = vst [vmem:[%s957_s8 + $0x28] sm:$0xff] %v395_v62  ;;  %v390_v1 = vadd.f32 %v389_v0, %v284_v63  ;;  %v622_v2 = vpop.f32.mrf.mxu0 }
 0x102   : > { %v666_v3 = vpop.f32.mrf.mxu1 }
 0x103   : > { %412 = vst [vmem:[%s957_s8 + $0x20] sm:$0xff] %v390_v1  ;;  %v405_v4 = vadd.f32 %v666_v3, %v622_v2  ;;  %v294_v5 = vpop.f32.mrf.mxu0 }
 0x104   : > { %v399_v6 = vpop.f32.mrf.mxu1 }
 0x105   : > { %415 = vst [vmem:[%s957_s8 + $0x38] sm:$0xff] %v405_v4  ;;  %v400_v7 = vadd.f32 %v399_v6, %v294_v5 }
 0x107   : > { %414 = vst [vmem:[%s957_s8 + $0x30] sm:$0xff] %v400_v7 }
 0x108   : > { %721 = shalt.err (!%p718_p3)
}
 0x109   : > { %s722_s26 = scalar_lea.hbm %s970_s22, 1024  ;;  %s726_s29 = scalar_lea.hbm %s1020_s2, 2048 }
 0x10a   : > { %p723_p4 = scmp.ne.s32.totalorder %s970_s22, %s722_s26  ;;  %p727_p9 = scmp.lt.s32.totalorder %s970_s22, %s1020_s2 }
 0x10b   : > { %p728_p10 = scmp.lt.s32.totalorder %s726_s29, %s722_s26 }
 0x10c   : > { %p724_p7 = pnand %p723_p4, %p826_p5 }
 0x10d   : > { %p729_p11 = por %p728_p10, %p727_p9 }
 0x10e   : > { %p725_p8 = pneg %p724_p7 }
 0x110   : > { %p730_p12 = pnand %p729_p11, %p725_p8 }
 0x112   : > { %733 = shalt.err (!%p730_p12)
}
 0x113   : > { %s771_s4 = smov 128   ;;  %s772_s5 = smov 8  }
 0x114   : > { %667 = dma.vmem_to_hbm [thread:$0]  (%p826_p5), %s972_s16, 1024, %s970_s22, %s978_s13, %s771_s4, %s771_s4, %s772_s5  }
 0x115 PF: > { %p673_p13 = scmp.ge.s32.totalorder %s768_s12, 2  ;;  %s445_s7 = sand.u32 1, %s756_s9  }
 0x116   : > { %s446_s8 = scalar_lea.sflag [#allocation3], %s445_s7 }
 0x117   : > { %p670_p0 = pnand %p673_p13, %p830_p6 }
 0x119   : > { %p671_p1 = pneg %p670_p0 }
 0x11b   : > { %751 = dma.done.wait (%p671_p1), %s446_s8, 1024  }
 0x11c   : > { %753 = vsyncadd (%p671_p1), %s446_s8, 4294966272  ;;  %p12_p2 = scmp.ge.s32.totalorder %s813_s15, 4   ;;  %s1023_s9 = smov %s760_s10 }
 0x11d   : > { %s1024_s10 = smov %s764_s11  ;;  %s1025_s11 = smov %s824_s18 }
 0x11e   : > { %s1026_s12 = smov %s813_s15  ;;  %14 = sbr.rel (!%p12_p2) target bundleno = 3 (0x3), region = 65 }
 0x123   :  { %451 = vsyncpa [#allocation3], 1 }
 0x124   :  { %453 = vsyncpa [#allocation3 + $0x1], 1 }

</bundles_post_ra>
